<compile_context>
chip_gen: v7x
topology: tpu7x:2x2x1
jax: 0.10.0
libtpu: 0.0.40
codegen_flags: <defaults>
</compile_context>

<pallas_src>
import functools

import jax
import jax.numpy as jnp
from jax import lax
from jax.experimental import pallas as pl
from jax.experimental.pallas import tpu as pltpu


def _per_lang_kernel(tile_ref, wid_ref, rs_ref, re_ref, fv_ref,
                     x_ref, w_ref, b_ref, o_ref, *, seq_len):
    """One grouped-matmul step: y = x_tile @ W_g + b_g, masked to the rows of
    this sample-tile that belong to group g; zero-init / accumulate the tile."""
    t = pl.program_id(0)

    x = x_ref[...]                                   # (Bn*P, Dp)  bf16
    w = w_ref[0]                                     # (Dp, Dp)    bf16, (in, out)
    y = jnp.dot(x, w, preferred_element_type=jnp.float32)       # MXU, f32 acc
    y = y + b_ref[0][:1, :]                          # (1, Dp) f32 bias broadcast

    # Keep only rows (samples) of this tile that belong to group g.
    m = x_ref.shape[0]
    row = lax.broadcasted_iota(jnp.int32, (m, 1), 0)
    lo = rs_ref[t] * seq_len
    hi = re_ref[t] * seq_len
    y = jnp.where((row >= lo) & (row < hi), y, 0.0)

    @pl.when(fv_ref[t] != 0)
    def _init():
        o_ref[...] = y

    @pl.when(fv_ref[t] == 0)
    def _accumulate():
        o_ref[...] = o_ref[...] + y


def _make_schedule(lang_sorted, num_layers, block_samples):
    """Megablox-style grouped-matmul schedule.

    lang_sorted: (Np,) int32 ascending, values in [0, L]; L is the sentinel
      group for samples matching no layer (their output stays zero).
    Returns int32 arrays of static length T = tiles_m + L:
      tile_ids, w_ids, row_start, row_end, first_visit.
    """
    n_padded = lang_sorted.shape[0]
    tiles_m = n_padded // block_samples
    num_groups = num_layers + 1                      # + sentinel group
    num_steps = tiles_m + num_groups - 1             # static upper bound

    counts = jnp.bincount(lang_sorted, length=num_groups).astype(jnp.int32)
    off = jnp.concatenate([jnp.zeros((1,), jnp.int32),
                           jnp.cumsum(counts).astype(jnp.int32)])        # (G+1,)

    first_tile = off[:-1] // block_samples
    last_tile = jnp.where(counts > 0, (off[1:] - 1) // block_samples,
                          first_tile - 1)
    tiles_touched = jnp.maximum(last_tile - first_tile + 1, 0)

    visit_start = jnp.concatenate([jnp.zeros((1,), jnp.int32),
                                   jnp.cumsum(tiles_touched).astype(jnp.int32)])
    num_visits = visit_start[-1]

    t = jnp.arange(num_steps, dtype=jnp.int32)
    group_ids = jnp.searchsorted(visit_start[1:], t, side="right").astype(jnp.int32)
    group_ids = jnp.minimum(group_ids, num_groups - 1)
    valid = t < num_visits

    tile_ids = first_tile[group_ids] + (t - visit_start[group_ids])
    tile_ids = jnp.where(valid, tile_ids, tiles_m - 1).astype(jnp.int32)

    row_start = jnp.clip(off[group_ids] - tile_ids * block_samples, 0, block_samples)
    row_end = jnp.clip(off[group_ids + 1] - tile_ids * block_samples, 0, block_samples)
    masked_out = (~valid) | (group_ids == num_layers)   # sentinel / padding steps
    row_start = jnp.where(masked_out, 0, row_start).astype(jnp.int32)
    row_end = jnp.where(masked_out, 0, row_end).astype(jnp.int32)

    w_ids = jnp.minimum(group_ids, num_layers - 1).astype(jnp.int32)

    prev_tile = jnp.concatenate([jnp.full((1,), -1, jnp.int32), tile_ids[:-1]])
    first_visit = (tile_ids != prev_tile).astype(jnp.int32)

    return tile_ids, w_ids, row_start, row_end, first_visit


def prepare_params(embed_table, weights, biases, compute_dtype=jnp.bfloat16):
    """One-time parameter prep (outside the per-call hot path)."""
    vocab, d_model = embed_table.shape
    num_layers = weights.shape[0]
    assert num_layers >= 1
    d_pad = ((d_model + 127) // 128) * 128
    pad = d_pad - d_model

    et = jnp.pad(embed_table, ((0, 0), (0, pad))) if pad else embed_table
    w = jnp.pad(weights, ((0, 0), (0, pad), (0, pad))) if pad else weights
    b = jnp.pad(biases, ((0, 0), (0, pad))) if pad else biases

    return {
        "embed_table": et.astype(compute_dtype),                    # (V, Dp) bf16
        "w_t": jnp.transpose(w, (0, 2, 1)).astype(compute_dtype),   # (L, Dp, Dp) (in, out)
        # (L, 8, Dp) f32 slab (row 0 = bias) so the bias block is (8,128)-aligned.
        "bias_slab": jnp.pad(b.astype(jnp.float32)[:, None, :], ((0, 0), (0, 7), (0, 0))),
        "d_model": d_model,
        "d_pad": d_pad,
        "num_layers": num_layers,
    }


def _choose_block_samples(n, p, target_rows=256):
    bn = max(1, min(max(target_rows // max(p, 1), 1), n))
    while (bn * p) % 8 != 0:          # (Bn*P, Dp) blocks must be sublane aligned
        bn += 1
    return bn


def per_lang_embedding_forward(sequences, params):
    n, p, g = sequences.shape
    assert g == 1, "trailing group axis must be 1 (see module notes)"
    d_model, d_pad, num_layers = params["d_model"], params["d_pad"], params["num_layers"]
    et, w_t, bias_slab = params["embed_table"], params["w_t"], params["bias_slab"]

    # Per-sample language id; sort by language so each weight is streamed once.
    tok0 = sequences[:, 0, 0].astype(jnp.int32)
    lang = jnp.where((tok0 >= 0) & (tok0 < num_layers), tok0,
                     num_layers).astype(jnp.int32)               # sentinel = L
    order = jnp.argsort(lang)
    inv = jnp.argsort(order)                                     # un-permute at end

    bn = _choose_block_samples(n, p)
    tiles_m = (n + bn - 1) // bn
    n_pad = tiles_m * bn
    extra = n_pad - n

    lang_sorted = jnp.take(lang, order, axis=0)
    tok_sorted = jnp.take(sequences[:, :, 0], order, axis=0)
    if extra:
        lang_sorted = jnp.concatenate(
            [lang_sorted, jnp.full((extra,), num_layers, jnp.int32)])
        tok_sorted = jnp.concatenate(
            [tok_sorted, jnp.zeros((extra, p), tok_sorted.dtype)], axis=0)

    # Embedding gather (already in sorted order, bf16, lane-padded).
    # TODO(synk): fuse this gather into the kernel via manual row DMAs.
    x = jnp.take(et, tok_sorted, axis=0).reshape(n_pad * p, d_pad)

    tile_ids, w_ids, row_start, row_end, first_visit = _make_schedule(
        lang_sorted, num_layers, bn)
    num_steps = tile_ids.shape[0]

    block_rows = bn * p
    vmem_est = 2 * (d_pad * d_pad * w_t.dtype.itemsize
                    + block_rows * d_pad * (x.dtype.itemsize + 4)
                    + 8 * d_pad * 4)
    vmem_limit = int(min(max(4 * vmem_est, 32 * 1024 * 1024), 64 * 1024 * 1024))

    kernel = functools.partial(_per_lang_kernel, seq_len=p)
    out2d = pl.pallas_call(
        kernel,
        out_shape=jax.ShapeDtypeStruct((n_pad * p, d_pad), jnp.float32),
        grid_spec=pltpu.PrefetchScalarGridSpec(
            num_scalar_prefetch=5,
            grid=(num_steps,),
            in_specs=[
                pl.BlockSpec((block_rows, d_pad),
                             lambda t, tid, wid, rs, re, fv: (tid[t], 0)),
                pl.BlockSpec((1, d_pad, d_pad),
                             lambda t, tid, wid, rs, re, fv: (wid[t], 0, 0)),
                pl.BlockSpec((1, 8, d_pad),
                             lambda t, tid, wid, rs, re, fv: (wid[t], 0, 0)),
            ],
            out_specs=pl.BlockSpec((block_rows, d_pad),
                                   lambda t, tid, wid, rs, re, fv: (tid[t], 0)),
        ),
        compiler_params=pltpu.CompilerParams(
            # Steps accumulate into the resident output tile, so this axis must
            # stay sequential.  TODO(synk): add a "parallel" output-feature
            # tile axis for v7x's two TensorCores.
            dimension_semantics=("arbitrary",),
            vmem_limit_bytes=vmem_limit,
        ),
    )(tile_ids, w_ids, row_start, row_end, first_visit, x, w_t, bias_slab)

    out = out2d.reshape(n_pad, p, d_pad)
    # TODO(synk): fuse this un-permute (sorted -> original order) into the kernel.
    return jnp.take(out, inv, axis=0)[:, :, :d_model]


def per_lang_embedding_reference(sequences, embed_table, weights, biases):
    """Pure-JAX f32 reference of the PyTorch forward semantics."""
    n, p, g = sequences.shape
    num_layers = weights.shape[0]
    emb = jnp.take(embed_table, sequences[:, :, 0], axis=0).astype(jnp.float32)
    out = jnp.zeros((n, p, weights.shape[1]), jnp.float32)
    for i in range(num_layers):
        mask = jnp.any(sequences[:, 0, :] == i, axis=1)
        y = emb @ weights[i].T + biases[i]
        out = out + jnp.where(mask[:, None, None], y, 0.0)
    return out


if __name__ == "__main__":
    vocab_size, d_model, n_layers = 64, 32, 3
    N, P, G = 4, 8, 1

    key = jax.random.PRNGKey(0)
    k_emb, k_w, k_b, k_seq = jax.random.split(key, 4)

    embed_table = jax.random.normal(k_emb, (vocab_size, d_model), jnp.float32)
    weights = jax.random.normal(k_w, (n_layers, d_model, d_model), jnp.float32) * 0.1
    biases = jax.random.normal(k_b, (n_layers, d_model), jnp.float32) * 0.1

    sequences = jax.random.randint(k_seq, (N, P, G), 0, vocab_size, dtype=jnp.int32)
    # Language ids at position 0 (unsorted, with one out-of-range id -> zeros).
    sequences = sequences.at[:, 0, 0].set(jnp.array([2, 0, 7, 1], dtype=jnp.int32))

    params = prepare_params(embed_table, weights, biases)      # one-time prep
    out = per_lang_embedding_forward(sequences, params)
    out = jax.block_until_ready(out)

    ref = per_lang_embedding_reference(sequences, embed_table, weights, biases)
    assert out.shape == (N, P, d_model)
    # bf16 weights/activations (f32 accumulation) -> relaxed tolerance vs f32 ref.
    assert jnp.allclose(out, ref, atol=5e-2, rtol=5e-2), "mismatch vs reference"

    print("KERNEL_OK")
</pallas_src>

<mosaic_0001>
module attributes {stable_mosaic.version = 11 : i64} {
  func.func @_per_lang_kernel(%arg0: i32, %arg1: memref<4xi32, #tpu.memory_space<smem>>, %arg2: memref<4xi32, #tpu.memory_space<smem>>, %arg3: memref<4xi32, #tpu.memory_space<smem>>, %arg4: memref<4xi32, #tpu.memory_space<smem>>, %arg5: memref<4xi32, #tpu.memory_space<smem>>, %arg6: memref<32x128xbf16, #tpu.memory_space<vmem>>, %arg7: memref<1x128x128xbf16, #tpu.memory_space<vmem>>, %arg8: memref<1x8x128xf32, #tpu.memory_space<vmem>>, %arg9: memref<32x128xf32, #tpu.memory_space<vmem>>) attributes {dimension_semantics = [#tpu.dimension_semantics<arbitrary>], iteration_bounds = array<i64: 4>, scalar_prefetch = 5 : i64, scratch_operands = 0 : i64, tpu.core_type = #tpu.core_type<tc>, window_params = [{transform_indices = @transform_0, window_bounds = array<i64: 32, 128>}, {transform_indices = @transform_1, window_bounds = array<i64: 1, 128, 128>}, {transform_indices = @transform_2, window_bounds = array<i64: 1, 8, 128>}, {transform_indices = @transform_3, window_bounds = array<i64: 32, 128>}]} {
    %c0 = arith.constant 0 : index
    %c0_0 = arith.constant 0 : index
    %0 = vector.load %arg6[%c0, %c0_0] : memref<32x128xbf16, #tpu.memory_space<vmem>>, vector<32x128xbf16>
    %c0_1 = arith.constant 0 : index
    %c0_2 = arith.constant 0 : index
    %c0_3 = arith.constant 0 : index
    %1 = vector.load %arg7[%c0_1, %c0_2, %c0_3] : memref<1x128x128xbf16, #tpu.memory_space<vmem>>, vector<1x128x128xbf16>
    %2 = vector.shape_cast %1 : vector<1x128x128xbf16> to vector<128x128xbf16>
    %cst = arith.constant dense<0.000000e+00> : vector<32x128xf32>
    %3 = tpu.matmul %0, %2, %cst {dimension_numbers = #tpu.dot_dimension_numbers<[1], [0], [0], [1], [0, 0, 1, 1], [], []>} : vector<32x128xbf16>, vector<128x128xbf16>, vector<32x128xf32> -> vector<32x128xf32>
    %c0_4 = arith.constant 0 : index
    %c0_5 = arith.constant 0 : index
    %c0_6 = arith.constant 0 : index
    %4 = vector.load %arg8[%c0_4, %c0_5, %c0_6] : memref<1x8x128xf32, #tpu.memory_space<vmem>>, vector<1x8x128xf32>
    %5 = vector.shape_cast %4 : vector<1x8x128xf32> to vector<8x128xf32>
    %6 = vector.extract_strided_slice %5 {offsets = [0, 0], sizes = [1, 128], strides = [1, 1]} : vector<8x128xf32> to vector<1x128xf32>
    %7 = vector.broadcast %6 : vector<1x128xf32> to vector<32x128xf32>
    %8 = arith.addf %3, %7 : vector<32x128xf32>
    %9 = tpu.iota {dimensions = array<i32: 0>} : vector<32x1xi32>
    %10 = arith.index_cast %arg0 : i32 to index
    %11 = memref.load %arg3[%10] : memref<4xi32, #tpu.memory_space<smem>>
    %c8_i32 = arith.constant 8 : i32
    %12 = arith.muli %11, %c8_i32 : i32
    %13 = arith.index_cast %arg0 : i32 to index
    %14 = memref.load %arg4[%13] : memref<4xi32, #tpu.memory_space<smem>>
    %c8_i32_7 = arith.constant 8 : i32
    %15 = arith.muli %14, %c8_i32_7 : i32
    %16 = vector.broadcast %12 : i32 to vector<32x1xi32>
    %17 = arith.cmpi sge, %9, %16 : vector<32x1xi32>
    %18 = vector.broadcast %15 : i32 to vector<32x1xi32>
    %19 = arith.cmpi slt, %9, %18 : vector<32x1xi32>
    %20 = arith.andi %17, %19 : vector<32x1xi1>
    %cst_8 = arith.constant 0.000000e+00 : f32
    %21 = vector.shape_cast %20 : vector<32x1xi1> to vector<32x1xi1>
    %22 = vector.broadcast %21 : vector<32x1xi1> to vector<32x128xi1>
    %23 = vector.broadcast %cst_8 : f32 to vector<32x128xf32>
    %24 = arith.select %22, %8, %23 : vector<32x128xi1>, vector<32x128xf32>
    %25 = arith.index_cast %arg0 : i32 to index
    %26 = memref.load %arg5[%25] : memref<4xi32, #tpu.memory_space<smem>>
    %c0_i32 = arith.constant 0 : i32
    %27 = arith.cmpi ne, %26, %c0_i32 : i32
    %28 = arith.extui %27 : i1 to i32
    %c0_i32_9 = arith.constant 0 : i32
    %29 = arith.cmpi ne, %28, %c0_i32_9 : i32
    scf.if %29 {
      %c0_12 = arith.constant 0 : index
      %c0_13 = arith.constant 0 : index
      %35 = vector.load %arg9[%c0_12, %c0_13] : memref<32x128xf32, #tpu.memory_space<vmem>>, vector<32x128xf32>
      tpu.vector_store %arg9[%c0_12, %c0_13], %24 {strides = array<i32>} : memref<32x128xf32, #tpu.memory_space<vmem>>, vector<32x128xf32>,
    } else {
    }
    %30 = arith.index_cast %arg0 : i32 to index
    %31 = memref.load %arg5[%30] : memref<4xi32, #tpu.memory_space<smem>>
    %c0_i32_10 = arith.constant 0 : i32
    %32 = arith.cmpi eq, %31, %c0_i32_10 : i32
    %33 = arith.extui %32 : i1 to i32
    %c0_i32_11 = arith.constant 0 : i32
    %34 = arith.cmpi ne, %33, %c0_i32_11 : i32
    scf.if %34 {
      %c0_12 = arith.constant 0 : index
      %c0_13 = arith.constant 0 : index
      %35 = vector.load %arg9[%c0_12, %c0_13] : memref<32x128xf32, #tpu.memory_space<vmem>>, vector<32x128xf32>
      %36 = arith.addf %35, %24 : vector<32x128xf32>
      %c0_14 = arith.constant 0 : index
      %c0_15 = arith.constant 0 : index
      %37 = vector.load %arg9[%c0_14, %c0_15] : memref<32x128xf32, #tpu.memory_space<vmem>>, vector<32x128xf32>
      tpu.vector_store %arg9[%c0_14, %c0_15], %36 {strides = array<i32>} : memref<32x128xf32, #tpu.memory_space<vmem>>, vector<32x128xf32>,
    } else {
    }
    return
  }
  func.func @transform_0(%arg0: i32, %arg1: memref<4xi32, #tpu.memory_space<smem>>, %arg2: memref<4xi32, #tpu.memory_space<smem>>, %arg3: memref<4xi32, #tpu.memory_space<smem>>, %arg4: memref<4xi32, #tpu.memory_space<smem>>, %arg5: memref<4xi32, #tpu.memory_space<smem>>) -> (i32, i32) {
    %0 = arith.index_cast %arg0 : i32 to index
    %1 = memref.load %arg1[%0] : memref<4xi32, #tpu.memory_space<smem>>
    %c0_i32 = arith.constant 0 : i32
    %c0_i32_0 = arith.constant 0 : i32
    return %1, %c0_i32 : i32, i32
  }
  func.func @transform_1(%arg0: i32, %arg1: memref<4xi32, #tpu.memory_space<smem>>, %arg2: memref<4xi32, #tpu.memory_space<smem>>, %arg3: memref<4xi32, #tpu.memory_space<smem>>, %arg4: memref<4xi32, #tpu.memory_space<smem>>, %arg5: memref<4xi32, #tpu.memory_space<smem>>) -> (i32, i32, i32) {
    %0 = arith.index_cast %arg0 : i32 to index
    %1 = memref.load %arg2[%0] : memref<4xi32, #tpu.memory_space<smem>>
    %c0_i32 = arith.constant 0 : i32
    %c0_i32_0 = arith.constant 0 : i32
    %c0_i32_1 = arith.constant 0 : i32
    return %1, %c0_i32, %c0_i32_0 : i32, i32, i32
  }
  func.func @transform_2(%arg0: i32, %arg1: memref<4xi32, #tpu.memory_space<smem>>, %arg2: memref<4xi32, #tpu.memory_space<smem>>, %arg3: memref<4xi32, #tpu.memory_space<smem>>, %arg4: memref<4xi32, #tpu.memory_space<smem>>, %arg5: memref<4xi32, #tpu.memory_space<smem>>) -> (i32, i32, i32) {
    %0 = arith.index_cast %arg0 : i32 to index
    %1 = memref.load %arg2[%0] : memref<4xi32, #tpu.memory_space<smem>>
    %c0_i32 = arith.constant 0 : i32
    %c0_i32_0 = arith.constant 0 : i32
    %c0_i32_1 = arith.constant 0 : i32
    return %1, %c0_i32, %c0_i32_0 : i32, i32, i32
  }
  func.func @transform_3(%arg0: i32, %arg1: memref<4xi32, #tpu.memory_space<smem>>, %arg2: memref<4xi32, #tpu.memory_space<smem>>, %arg3: memref<4xi32, #tpu.memory_space<smem>>, %arg4: memref<4xi32, #tpu.memory_space<smem>>, %arg5: memref<4xi32, #tpu.memory_space<smem>>) -> (i32, i32) {
    %0 = arith.index_cast %arg0 : i32 to index
    %1 = memref.load %arg1[%0] : memref<4xi32, #tpu.memory_space<smem>>
    %c0_i32 = arith.constant 0 : i32
    %c0_i32_0 = arith.constant 0 : i32
    return %1, %c0_i32 : i32, i32
  }
}

</mosaic_0001>

<bundles_post_ra>
// kernel: tpu_custom_call.1
= control target key start
LH: loop header
LB: loop body
LE: loop exit
PB: predicated region body
PF: predicated region fallthrough
CT: control target
= control target key end

     0   :  { %s1475_s0 = inlined_call_operand.hbm [shape: s32[4], index: 0, kind: input, shape index: {}]   ;;  %s1476_s5 = inlined_call_operand.hbm [shape: bf16[32,128], index: 5, kind: input, shape index: {}]   ;;  %s1477_s6 = inlined_call_operand.hbm [shape: bf16[3,128,128], index: 6, kind: input, shape index: {}]   ;;  %s1478_s7 = inlined_call_operand.vmem [shape: f32[3,8,128], index: 7, kind: input, shape index: {}]   ;;  %s1479_s8 = inlined_call_operand.hbm [shape: f32[32,128], index: 8, kind: output, shape index: {}]   ;;  %s1480_s1 = inlined_call_operand.vmem [shape: s32[4], index: 1, kind: input, shape index: {}]   ;;  %s1481_s2 = inlined_call_operand.vmem [shape: s32[4], index: 2, kind: input, shape index: {}]   ;;  %s1482_s3 = inlined_call_operand.hbm [shape: s32[4], index: 3, kind: input, shape index: {}]   ;;  %s1483_s4 = inlined_call_operand.hbm [shape: s32[4], index: 4, kind: input, shape index: {}]  }
   0x1   :  { %1493 = sst [smem:[#allocation27_spill]] %s1476_s5  ;;  %s800_s29 = scalar_lea.hbm %s1475_s0, 16 }
   0x2   :  { %p801_p0 = scmp.ne.s32.totalorder %s1475_s0, %s800_s29  ;;  %p804_p1 = scmp.lt.u32.totalorder %s800_s29, %s1475_s0 }
   0x4   :  { %p806_p2 = pnand %p804_p1, %p801_p0 }
   0x6   :  { %809 = shalt.err (!%p806_p2)  }
   0x7   :  { %s1036_s12 = smov [#allocation3]   ;;  %s15_s17 = sshll.u32 %s1480_s1, 4  ;;  %s16_s17 = int_to_ptr.vmem [resolvable:$true] %s15_s17 }
   0x8   :  { %14 = dma.hbm_to_smem %s1475_s0, 16, %s1036_s12, [#allocation2] }
   0x9   :  { %s19_s20 = sshll.u32 %s1481_s2, 4  ;;  %s810_s21 = scalar_lea.vmem %s16_s17, 16  ;;  %s20_s20 = int_to_ptr.vmem [resolvable:$true] %s19_s20 }
   0xa   :  { %p811_p3 = scmp.ne.s32.totalorder %s16_s17, %s810_s21  ;;  %p815_p4 = scmp.lt.s32.totalorder %s16_s17, %s16_s17 }
   0xb   :  { %p816_p5 = scmp.lt.s32.totalorder %s810_s21, %s810_s21 }
   0xd   :  { %p817_p6 = por %p816_p5, %p815_p4 }
   0xf   :  { %p818_p7 = pnand %p817_p6, %p811_p3 }
  0x11   :  { %821 = shalt.err (!%p818_p7)  }
  0x12   :  { %s1037_s22 = smov [#allocation4]   ;;  %s822_s0 = scalar_lea.vmem %s20_s20, 16 }
  0x13   :  { %18 = dma.vmem_to_smem %s16_s17, 16, %s1037_s22, [#allocation2] }
  0x14   :  { %p823_p8 = scmp.ne.s32.totalorder %s20_s20, %s822_s0  ;;  %p827_p9 = scmp.lt.s32.totalorder %s20_s20, %s20_s20 }
  0x15   :  { %p828_p10 = scmp.lt.s32.totalorder %s822_s0, %s822_s0 }
  0x17   :  { %p829_p11 = por %p828_p10, %p827_p9 }
  0x19   :  { %p830_p12 = pnand %p829_p11, %p823_p8 }
  0x1b   :  { %833 = shalt.err (!%p830_p12)  }
  0x1c   :  { %s1038_s1 = smov [#allocation5]   ;;  %s834_s24 = scalar_lea.hbm %s1482_s3, 16 }
  0x1d   :  { %22 = dma.vmem_to_smem %s20_s20, 16, %s1038_s1, [#allocation2] }
  0x1e   :  { %p835_p13 = scmp.ne.s32.totalorder %s1482_s3, %s834_s24  ;;  %p838_p0 = scmp.lt.u32.totalorder %s834_s24, %s1482_s3 }
  0x20   :  { %p840_p1 = pnand %p838_p0, %p835_p13 }
  0x22   :  { %843 = shalt.err (!%p840_p1)  }
  0x23   :  { %s1039_s29 = smov [#allocation6]   ;;  %s844_s12 = scalar_lea.hbm %s1483_s4, 16 }
  0x24   :  { %24 = dma.hbm_to_smem %s1482_s3, 16, %s1039_s29, [#allocation2] }
  0x25   :  { %p845_p2 = scmp.ne.s32.totalorder %s1483_s4, %s844_s12  ;;  %p848_p3 = scmp.lt.u32.totalorder %s844_s12, %s1483_s4 }
  0x27   :  { %p850_p4 = pnand %p848_p3, %p845_p2 }
  0x29   :  { %853 = shalt.err (!%p850_p4)  }
  0x2a   :  { %s1040_s17 = smov [#allocation7]  }
  0x2b   :  { %26 = dma.hbm_to_smem %s1483_s4, 16, %s1040_s17, [#allocation2] }
  0x2c   :  { %982 = dma.done.wait [#allocation2], 80 }
  0x2d   :  { %983 = vsyncadd [#allocation2], 4294967216 }
  0x2e   :  { %28 = sfence }
  0x2f   :  { %29 = vsyncpa [#allocation9], 0 }
  0x30   :  { %31 = vsyncpa [#allocation9 + $0x1], 0 }
  0x31   :  { %32 = vsyncpa [#allocation12], 0 }
  0x32   :  { %34 = vsyncpa [#allocation12 + $0x1], 0 }
  0x33   :  { %35 = vsyncpa [#allocation10], 0 }
  0x34   :  { %37 = vsyncpa [#allocation10 + $0x1], 0  ;;  %s1135_s3 = smov 0   ;;  %s1137_s20 = smov 0  }
  0x35   :  { %s1139_s21 = smov 0   ;;  %s1141_s22 = smov 0  }
  0x36   :  { %s1143_s0 = smov 0   ;;  %s1145_s4 = smov 0  }
  0x37   :  { %s1147_s1 = smov 0   ;;  %s1149_s2 = smov 0  }
  0x38   :  { %s1151_s23 = smov 0   ;;  %s1153_s24 = smov 0  }
  0x39 LB: > { %1494 = sst [smem:[#allocation23_spill]] %s1030_s23  ;;  %s1184_s25 = sadd.s32 4294967295, %s1034_s24   ;;  %s1034_s24 = sphi %s1153_s24, %s1530_s24   ;;  %s1030_s23 = sphi %s1151_s23, %s1521_s23   ;;  %s1026_s2 = sphi %s1149_s2, %s1529_s2   ;;  %s1022_s1 = sphi %s1147_s1, %s1528_s1   ;;  %s1018_s4 = sphi %s1145_s4, %s1527_s4   ;;  %s1014_s0 = sphi %s1143_s0, %s1526_s0   ;;  %s1010_s22 = sphi %s1141_s22, %s1525_s22   ;;  %s1006_s21 = sphi %s1139_s21, %s1524_s21   ;;  %s1002_s20 = sphi %s1137_s20, %s1523_s20   ;;  %s998_s3 = sphi %s1135_s3, %s1522_s3  }
  0x3a   : > { %s606_s26 = sadd.s32 4294967294, %s1034_s24   ;;  %s1188_s27 = sadd.s32 1, %s1034_s24  }
  0x3b   : > { %s47_s28 = sld [smem:[#allocation3 + %s1034_s24]]  ;;  %s52_s30 = sadd.s32 1, %s1030_s23 }
  0x3c   : > { %s48_s29 = sld [smem:[#allocation3 + %s1188_s27]]  ;;  %p59_p5 = scmp.ne.s32.totalorder %s1030_s23, %s1026_s2 }
  0x3d   : > { %p1486_p6 = scmp.eq.s32.totalorder %s1034_s24, 0  ;;  %p65_p7 = scmp.ne.s32.totalorder %s1026_s2, %s1022_s1 }
  0x3e   : > { %p1487_p8 = scmp.eq.s32.totalorder %s1184_s25, 0  ;;  %s131_s10 = sld [smem:[#allocation3 + %s1034_s24]] }
  0x3f   : > { %p1200_p9 = por %p1486_p6, %p59_p5  ;;  %s132_s12 = sld [smem:[#allocation3 + %s1188_s27]] }
  0x40   : > { %p1207_p10 = por %p1487_p8, %p65_p7  ;;  %s136_s13 = sadd.s32 1, %s1006_s21 }
  0x41   : > { %p146_p11 = scmp.ne.s32.totalorder %s1006_s21, %s1002_s20  ;;  %p147_p12 = scmp.eq.s32.totalorder %s1184_s25, 3 }
  0x42   : > { %s1496_s11 = scalar_select %p1207_p10, 1, 0 }
  0x43   : > { %s49_s14 = ssub.s32 %s47_s28, %s48_s29  ;;  %p152_p0 = scmp.ne.s32.totalorder %s1002_s20, %s998_s3 }
  0x44   : > { %p50_p13 = scmp.eq.s32.totalorder %s49_s14, 0  ;;  %p1218_p1 = por %p147_p12, %p146_p11 }
  0x45   : > { %p153_p2 = scmp.eq.s32.totalorder %s606_s26, 3  ;;  %s133_s17 = ssub.s32 %s131_s10, %s132_s12 }
  0x46   : > { %s1497_s15 = scalar_select %p1218_p1, 1, 0 }
  0x47   : > { %s1223_s16 = scalar_select %p50_p13, %s1030_s23, %s52_s30  }
  0x48   : > { %p1225_p3 = por %p153_p2, %p152_p0  ;;  %p134_p4 = scmp.eq.s32.totalorder %s133_s17, 0 }
  0x49   : > { %1498 = sst [smem:[#allocation24_spill]] %s1223_s16  ;;  %p1485_p5 = scmp.lt.s32.totalorder %s1034_s24, 4 }
  0x4a   : > { %s1499_s18 = scalar_select %p1225_p3, 1, 0 }
  0x4b   : > { %s173_s19 = sand.u32 1, %s1030_s23   ;;  %p1238_p7 = pnand %p1485_p5, %p1200_p9 }
  0x4c   : > { %s1232_s1 = scalar_select %p134_p4, %s1006_s21, %s136_s13  }
  0x4d   : > { %s609_s28 = sshll.u32 %s173_s19, 4  ;;  %p615_p11 = scmp.ge.s32.totalorder %s1034_s24, 1 }
  0x4e   : > { %1500 = sst [smem:[#allocation25_spill]] %s1232_s1  ;;  %s177_s10 = scalar_lea.vmem [#allocation8], %s609_s28 }
  0x4f   : > { %s672_s29 = scalar_select %p1200_p9, [#allocation3], [#allocation14] }
  0x50   : > { %s673_s30 = scalar_select %p1200_p9, %s1034_s24, 0 }
  0x51   : > { %s1532_s29 = smov (!%p1485_p5, %s672_s29), [#allocation17]  ;;  %s185_s12 = sshll.u32 %s177_s10, 4  ;;  %s1251_s12 = int_to_ptr.vmem [resolvable:$true] %s185_s12 }
  0x52   : > { %s1534_s30 = smov (!%p1485_p5, %s673_s30), 0  ;;  %p224_p12 = scmp.lt.s32.totalorder %s1034_s24, 5 }
  0x53   : > { %s178_s13 = sld [smem:[%s1532_s29 + %s1534_s30]]  ;;  %s1267_s29 = scalar_lea.sflag [#allocation9], %s173_s19 }
  0x54   : > { %p1255_p13 = pnand %p615_p11, %p224_p12  ;;  %s1503_s5 = sld [smem:[#allocation27_spill]] }
  0x55   : > { %s1265_s28 = sld [smem:[#allocation4 + %s1034_s24]]  ;;  %p856_p0 = pneg %p1238_p7 }
  0x59   : > { %s639_s17 = sshll.u32 %s178_s13, 8 }
  0x5a   : > { %s1262_s23 = scalar_lea.hbm %s1503_s5, %s639_s17  ;;  %s859_s13 = scalar_lea.hbm %s1503_s5, 256 }
  0x5b   : > { %s854_s30 = scalar_lea.hbm %s1262_s23, 256  ;;  %p860_p11 = scmp.lt.u32.totalorder %s1262_s23, %s1503_s5 }
  0x5c   : > { %p855_p9 = scmp.ne.s32.totalorder %s1262_s23, %s854_s30  ;;  %p861_p12 = scmp.lt.u32.totalorder %s859_s13, %s854_s30 }
  0x5d   : > { %p863_p6 = scmp.lt.u32.totalorder %s854_s30, %s1262_s23 }
  0x5e   : > { %p857_p2 = pnand %p856_p0, %p855_p9  ;;  %p862_p5 = por %p861_p12, %p860_p11 }
  0x60   : > { %p858_p4 = pneg %p857_p2  ;;  %p864_p8 = por %p863_p6, %p862_p5 }
  0x62   : > { %p865_p3 = pnand %p864_p8, %p858_p4 }
  0x64   : > { %868 = shalt.err (!%p865_p3)
}
  0x65   : > { %s869_s19 = scalar_lea.vmem %s1251_s12, 256  ;;  %s1041_s10 = smov [#allocation8]  }
  0x66   : > { %p870_p9 = scmp.ne.s32.totalorder %s1251_s12, %s869_s19  ;;  %s874_s16 = sshll.u32 %s1041_s10, 4  ;;  %s875_s16 = int_to_ptr.vmem [resolvable:$false] %s874_s16 }
  0x67   : > { %s876_s17 = scalar_lea.vmem %s875_s16, 512  ;;  %p877_p10 = scmp.lt.s32.totalorder %s1251_s12, %s875_s16 }
  0x68   : > { %p872_p2 = pnand %p870_p9, %p856_p0  ;;  %p878_p11 = scmp.lt.s32.totalorder %s876_s17, %s869_s19 }
  0x6a   : > { %p873_p1 = pneg %p872_p2  ;;  %p879_p12 = por %p878_p11, %p877_p10 }
  0x6c   : > { %p880_p6 = pnand %p879_p12, %p873_p1 }
  0x6e   : > { %883 = shalt.err (!%p880_p6)
}
  0x6f   : > { %s1490_s30 = smov 64   ;;  %s1491_s13 = smov 4  }
  0x70   : > { %689 = dma.hbm_to_vmem [thread:$0]  (!%p1238_p7), %s1262_s23, 256, %s1251_s12, %s1267_s29, %s1490_s30, %s1490_s30, %s1491_s13  }
  0x71   : > { %s76_s9 = sld [smem:[#allocation4 + %s1188_s27]]  ;;  %p87_p8 = scmp.ne.s32.totalorder %s1018_s4, %s1014_s0 }
  0x72   : > { %p93_p10 = scmp.ne.s32.totalorder %s1014_s0, %s1010_s22  ;;  %p1504_p1 = scmp.eq.s32.totalorder %s1184_s25, 0 }
  0x73   : > { %s195_s10 = sand.u32 1, %s1018_s4   ;;  %p1506_p5 = scmp.eq.s32.totalorder %s1034_s24, 0 }
  0x74   : > { %p1305_p3 = por %p93_p10, %p1504_p1  ;;  %s80_s16 = sadd.s32 1, %s1018_s4 }
  0x75   : > { %p89_p0 = por %p87_p8, %p1506_p5  ;;  %s612_s26 = sshll.u32 %s195_s10, 6 }
  0x76   : > { %s1505_s19 = scalar_select %p1305_p3, 1, 0 }
  0x77   : > { %s77_s17 = ssub.s32 %s1265_s28, %s76_s9  ;;  %p1507_p9 = scmp.lt.s32.totalorder %s1034_s24, 4 }
  0x78   : > { %p78_p4 = scmp.eq.s32.totalorder %s77_s17, 0  ;;  %s199_s30 = scalar_lea.vmem [#allocation11], %s612_s26 }
  0x79   : > { %p1316_p2 = pnand %p1507_p9, %p89_p0  ;;  %p1510_p7 = pmov %p1507_p9 }
  0x7a   : > { %s675_s22 = scalar_select %p89_p0, [#allocation4], [#allocation15] }
  0x7b   : > { %s1321_s23 = scalar_select %p78_p4, %s1018_s4, %s80_s16  }
  0x7c   : > { %s676_s12 = scalar_select %p89_p0, %s1034_s24, 0 }
  0x7d   : > { %1509 = sst [smem:[#allocation26_spill]] %s1321_s23  ;;  %s1536_s22 = smov (!%p1510_p7, %s675_s22), [#allocation18] }
  0x7e   : > { %p1511_p11 = pmov %p1510_p7  ;;  %s207_s28 = sshll.u32 %s199_s30, 4  ;;  %s1328_s28 = int_to_ptr.vmem [resolvable:$true] %s207_s28 }
  0x7f   : > { %s1335_s16 = scalar_lea.sflag [#allocation12], %s195_s10  ;;  %p886_p6 = pneg %p1316_p2 }
  0x80   : > { %s1538_s12 = smov (!%p1511_p11, %s676_s12), 0  ;;  %s889_s13 = scalar_lea.hbm %s1477_s6, 3072 }
  0x81   : > { %s200_s29 = sld [smem:[%s1536_s22 + %s1538_s12]] }
  0x87   : > { %s640_s9 = sshll.u32 %s200_s29, 10 }
  0x88   : > { %s1333_s1 = scalar_lea.hbm %s1477_s6, %s640_s9 }
  0x89   : > { %s884_s23 = scalar_lea.hbm %s1333_s1, 1024  ;;  %p890_p1 = scmp.lt.u32.totalorder %s1333_s1, %s1477_s6 }
  0x8a   : > { %p885_p12 = scmp.ne.s32.totalorder %s1333_s1, %s884_s23  ;;  %p891_p5 = scmp.lt.u32.totalorder %s889_s13, %s884_s23 }
  0x8b   : > { %p893_p4 = scmp.lt.u32.totalorder %s884_s23, %s1333_s1 }
  0x8c   : > { %p887_p8 = pnand %p886_p6, %p885_p12  ;;  %p892_p0 = por %p891_p5, %p890_p1 }
  0x8e   : > { %p888_p10 = pneg %p887_p8  ;;  %p894_p9 = por %p893_p4, %p892_p0 }
  0x90   : > { %p895_p7 = pnand %p894_p9, %p888_p10 }
  0x92   : > { %898 = shalt.err (!%p895_p7)
}
  0x93   : > { %s899_s10 = scalar_lea.vmem %s1328_s28, 1024  ;;  %s1044_s29 = smov [#allocation11]  }
  0x94   : > { %p900_p11 = scmp.ne.s32.totalorder %s1328_s28, %s899_s10  ;;  %s904_s9 = sshll.u32 %s1044_s29, 4  ;;  %s905_s9 = int_to_ptr.vmem [resolvable:$false] %s904_s9 }
  0x95   : > { %s906_s17 = scalar_lea.vmem %s905_s9, 2048  ;;  %p907_p3 = scmp.lt.s32.totalorder %s1328_s28, %s905_s9 }
  0x96   : > { %p902_p12 = pnand %p900_p11, %p886_p6  ;;  %p908_p1 = scmp.lt.s32.totalorder %s906_s17, %s899_s10 }
  0x98   : > { %p903_p8 = pneg %p902_p12  ;;  %p909_p5 = por %p908_p1, %p907_p3 }
  0x9a   : > { %p910_p0 = pnand %p909_p5, %p903_p8 }
  0x9c   : > { %913 = shalt.err (!%p910_p0)
}
  0x9d   : > { %s1512_s23 = smov 4   ;;  %s1513_s30 = smov 64  }
  0x9e   : > { %694 = dma.hbm_to_vmem [thread:$0]  (!%p1316_p2), %s1333_s1, 1024, %s1328_s28, %s1335_s16, %s1513_s30, %s1513_s30, %s1512_s23  }
  0x9f   : > { %228 = sbr.rel (%p1255_p13) target bundleno = 465 (0x1d1), region = 32  ;;  %s230_s26 = sand.u32 (!%p1255_p13), 1, %s1026_s2  }
  0xa0   : > { %s1369_s13 = sshll.u32 (!%p1255_p13), %s230_s26, 4  ;;  %s231_s22 = scalar_lea.sflag (!%p1255_p13), [#allocation9], %s230_s26 }
  0xa1   : > { %s234_s12 = scalar_lea.vmem (!%p1255_p13), [#allocation8], %s1369_s13  ;;  %p1514_p3 = scmp.ne.s32.totalorder (!%p1255_p13), %s1496_s11, 0 }
  0xa6   : > { %985 = dma.done.wait (%p1514_p3), %s231_s22, 256  }
  0xa7   : > { %987 = vsyncadd (%p1514_p3), %s231_s22, 4294967040  ;;  %s239_s5 = sand.u32 1, %s1014_s0   ;;  %p1515_p13 = scmp.ne.s32.totalorder %s1505_s19, 0 }
  0xa8   : > { %s617_s1 = sshll.u32 %s239_s5, 6  ;;  %s240_s28 = scalar_lea.sflag [#allocation12], %s239_s5 }
  0xa9   : > { %s243_s14 = scalar_lea.vmem [#allocation11], %s617_s1 }
  0xaa   : > { %989 = dma.done.wait (%p1515_p13), %s240_s28, 1024  }
  0xab   : > { %991 = vsyncadd (%p1515_p13), %s240_s28, 4294966272  ;;  %s273_s16 = sand.u32 1, %s1002_s20   ;;  %s1383_s10 = sld [smem:[#allocation7 + %s1184_s25]]  ;;  %v790_v0 = vld [vmem:[%s243_s14] sm:$0xff]   ;;  %v791_v1 = vld [vmem:[%s243_s14 + $0x8] sm:$0xff]   ;;  %v309_v10 = vlaneseq }
  0xac   : > { %s1387_s11 = sshll.u32 %s273_s16, 5  ;;  %652 = vmatprep.subr.bf16.mxu0 %v790_v0  ;;  %v792_v2 = vld [vmem:[%s243_s14 + $0x10] sm:$0xff]   ;;  %v793_v3 = vld [vmem:[%s243_s14 + $0x18] sm:$0xff]   ;;  %v794_v5 = vld [vmem:[%s243_s14 + $0x20] sm:$0xff]   ;;  %s279_s19 = sld [smem:[#allocation4 + %s1184_s25]] }
  0xad   : > { %653 = vmatpush3.bf16.msra.mxu0 %v790_v0  ;;  %v798_v4 = vld [vmem:[%s234_s12] sm:$0xff]   ;;  %v795_v6 = vld [vmem:[%s243_s14 + $0x28] sm:$0xff]   ;;  %v797_v8 = vld [vmem:[%s243_s14 + $0x38] sm:$0xff]   ;;  %s427_s29 = sld [smem:[#allocation5 + %s1184_s25]]  ;;  %v310_v11 = vshrl.u32 %v309_v10, 7  ;;  %s275_s13 = scalar_lea.vmem [#allocation13], %s1387_s11 }
  0xae   : > { %654 = vmatprep.subr.bf16.mxu0 %v791_v1  ;;  %668 = vmatprep.mubr.bf16.mxu0 %v798_v4  ;;  %v796_v7 = vld [vmem:[%s243_s14 + $0x30] sm:$0xff]   ;;  %v799_v9 = vld [vmem:[%s234_s12 + $0x8] sm:$0xff]   ;;  %s429_s9 = sld [smem:[#allocation6 + %s1184_s25]] }
  0xaf   : > { %v311_v12 = vsub.s32 0, %v310_v11  ;;  %v425_v13 = vadd.s32 16, %v310_v11  ;;  %v426_v17 = vadd.s32 24, %v310_v11  ;;  %v424_v18 = vadd.s32 8, %v310_v11 }
  0xb1   : > { %655 = vmatpush3.bf16.msra.mxu0 %v791_v1  ;;  %p632_p6 = scmp.eq.s32.totalorder %s1383_s10, 0 }
  0xb2   : > { %656 = vmatprep.subr.bf16.mxu0 %v792_v2  ;;  %p280_p2 = scmp.lt.s32.totalorder %s279_s19, 2 }
  0xb3   : > { %s630_s22 = sshll.u32 %s427_s29, 3 }
  0xb4   : > { %s1540_s19 = smov (!%p280_p2, %s279_s19), 2  ;;  %s631_s5 = sshll.u32 %s429_s9, 3  ;;  %v431_v15 = vstv %s630_s22 }
  0xb5   : > { %657 = vmatpush3.bf16.msra.mxu0 %v792_v2  ;;  %s619_s17 = sshll.u32 %s1540_s19, 3  ;;  %v436_v16 = vstv %s631_s5  ;;  %vm434_vm0 = vcmp.ge.s32.totalorder %v425_v13, %v431_v15  ;;  %vm432_vm2 = vcmp.ge.s32.totalorder %v310_v11, %v431_v15  ;;  %vm435_vm4 = vcmp.ge.s32.totalorder %v426_v17, %v431_v15 }
  0xb6   : > { %658 = vmatprep.subr.bf16.mxu0 %v793_v3  ;;  %s283_s26 = scalar_lea.vmem %s1478_s7, %s619_s17  ;;  %vm439_vm1 = vcmp.lt.s32.totalorder %v425_v13, %v436_v16  ;;  %vm437_vm3 = vcmp.lt.s32.totalorder %v310_v11, %v436_v16  ;;  %vm440_vm5 = vcmp.lt.s32.totalorder %v426_v17, %v436_v16  ;;  %vm433_vm7 = vcmp.ge.s32.totalorder %v424_v18, %v431_v15 }
  0xb7   : > { %v308_v14 = vld [vmem:[%s283_s26] sm:$0xff]  ;;  %vm443_vm6 = vmand %vm434_vm0, %vm439_vm1  ;;  %vm438_vm8 = vcmp.lt.s32.totalorder %v424_v18, %v436_v16 }
  0xb8   : > { %v312_v19 = vrot.slane %v308_v14, %v311_v12  ;;  %vm441_vm9 = vmand %vm432_vm2, %vm437_vm3 }
  0xb9   : > { %659 = vmatpush3.bf16.msra.mxu0 %v793_v3  ;;  %vm444_vm10 = vmand %vm435_vm4, %vm440_vm5 }
  0xba   : > { %660 = vmatprep.subr.bf16.mxu0 %v794_v5  ;;  %vm442_vm11 = vmand %vm433_vm7, %vm438_vm8 }
  0xbd   : > { %661 = vmatpush3.bf16.msra.mxu0 %v794_v5 }
  0xbe   : > { %662 = vmatprep.subr.bf16.mxu0 %v795_v6 }
  0xc1   : > { %663 = vmatpush3.bf16.msra.mxu0 %v795_v6 }
  0xc2   : > { %664 = vmatprep.subr.bf16.mxu0 %v796_v7 }
  0xc5   : > { %665 = vmatpush3.bf16.msra.mxu0 %v796_v7 }
  0xc6   : > { %666 = vmatprep.subr.bf16.mxu0 %v797_v8 }
  0xc9   : > { %667 = vmatpush3.bf16.msra.mxu0 %v797_v8 }
  0xcc   : > { %669 = vmatmul.mubr.bf16.vlgmr.msra.gmra.mrb[0].mxu0 %v799_v9 }
 0x19f   : > { %v670_v20 = vpop.f32.mrb[0].mxu0  ;;  %461 = sbr.rel (%p632_p6) target bundleno = 423 (0x1a7), region = 44 }
 0x1a0   : > { %v416_v21 = vadd.f32 %v670_v20, %v312_v19  ;;  %v407_v22 = vpop.f32.mrb[1].mxu0 }
 0x1a1   : > { %v408_v23 = vadd.f32 %v407_v22, %v312_v19  ;;  %v671_v24 = vpop.f32.mrb[2].mxu0 }
 0x1a2   : > { %v455_v25 = vsel %vm443_vm6, %v416_v21, 0.0  ;;  %v419_v26 = vadd.f32 %v671_v24, %v312_v19  ;;  %v410_v27 = vpop.f32.mrb[3].mxu0 }
 0x1a3   : > { %v453_v28 = vsel %vm441_vm9, %v408_v23, 0.0  ;;  %v411_v29 = vadd.f32 %v410_v27, %v312_v19  ;;  %464 = vst [vmem:[%s275_s13 + $0x10] sm:$0xff] (!%p632_p6), %v455_v25 }
 0x1a4   : > { %v456_v30 = vsel %vm444_vm10, %v419_v26, 0.0  ;;  %462 = vst [vmem:[%s275_s13] sm:$0xff] (!%p632_p6), %v453_v28 }
 0x1a5   : > { %v454_v31 = vsel %vm442_vm11, %v411_v29, 0.0  ;;  %465 = vst [vmem:[%s275_s13 + $0x18] sm:$0xff] (!%p632_p6), %v456_v30 }
 0x1a6   : > { %463 = vst [vmem:[%s275_s13 + $0x8] sm:$0xff] %v454_v31 }
 0x1a7 PF: > { %s466_s12 = sld [smem:[#allocation7 + %s1184_s25]] }
 0x1ad   : > { %p633_p10 = scmp.ne.s32.totalorder %s466_s12, 0 }
 0x1ae   : > { %v471_v32 = vld [vmem:[%s275_s13] sm:$0xff] (!%p633_p10)  ;;  %v472_v33 = vld [vmem:[%s275_s13 + $0x8] sm:$0xff] (!%p633_p10)  ;;  %v473_v34 = vld [vmem:[%s275_s13 + $0x10] sm:$0xff] (!%p633_p10) }
 0x1af   : > { %470 = sbr.rel (%p633_p10) target bundleno = 438 (0x1b6), region = 48  ;;  %v475_v35 = vadd.f32 (!%p633_p10), %v471_v32, %v453_v28  ;;  %v476_v36 = vadd.f32 (!%p633_p10), %v472_v33, %v454_v31  ;;  %v477_v37 = vadd.f32 (!%p633_p10), %v473_v34, %v455_v25  ;;  %v474_v38 = vld [vmem:[%s275_s13 + $0x18] sm:$0xff] (!%p633_p10) }
 0x1b0   : > { %v478_v39 = vadd.f32 (!%p633_p10), %v474_v38, %v456_v30 }
 0x1b1   : > { %479 = vst [vmem:[%s275_s13] sm:$0xff] (!%p633_p10), %v475_v35  ;;  %480 = vst [vmem:[%s275_s13 + $0x8] sm:$0xff] (!%p633_p10), %v476_v36 }
 0x1b2   : > { %481 = vst [vmem:[%s275_s13 + $0x10] sm:$0xff] (!%p633_p10), %v477_v37  ;;  %482 = vst [vmem:[%s275_s13 + $0x18] sm:$0xff] (!%p633_p10), %v478_v39 }
 0x1b6 PF: > { %p1516_p4 = scmp.ne.s32.totalorder %s1497_s15, 0  ;;  %s498_s14 = sshll.u32 %s275_s13, 4  ;;  %s1407_s14 = int_to_ptr.vmem [resolvable:$true] %s498_s14 }
 0x1b7   : > { %s1416_s9 = scalar_lea.sflag [#allocation10], %s273_s16  ;;  %s914_s17 = scalar_lea.vmem %s1407_s14, 512 }
 0x1b8   : > { %s680_s1 = scalar_select %p1516_p4, [#allocation3], [#allocation16] }
 0x1b9   : > { %s1542_s25 = smov (!%p1516_p4, %s1184_s25), 0  ;;  %p915_p9 = scmp.ne.s32.totalorder %s1407_s14, %s914_s17 }
 0x1ba   : > { %s491_s28 = sld [smem:[%s680_s1 + %s1542_s25]]  ;;  %s1045_s25 = smov [#allocation13]  }
 0x1bb   : > { %p916_p7 = pnand %p915_p9, %p1516_p4  ;;  %s918_s23 = sshll.u32 %s1045_s25, 4  ;;  %s919_s23 = int_to_ptr.vmem [resolvable:$false] %s918_s23 }
 0x1bc   : > { %s920_s30 = scalar_lea.vmem %s919_s23, 1024  ;;  %p921_p12 = scmp.lt.s32.totalorder %s1407_s14, %s919_s23 }
 0x1bd   : > { %p917_p11 = pneg %p916_p7  ;;  %p922_p8 = scmp.lt.s32.totalorder %s920_s30, %s914_s17 }
 0x1bf   : > { %p923_p1 = por %p922_p8, %p921_p12 }
 0x1c0   : > { %s641_s10 = sshll.u32 %s491_s28, 9 }
 0x1c1   : > { %s1412_s29 = scalar_lea.hbm %s1479_s8, %s641_s10  ;;  %p924_p5 = pnand %p923_p1, %p917_p11 }
 0x1c3   : > { %927 = shalt.err (!%p924_p5)
}
 0x1c4   : > { %s928_s16 = scalar_lea.hbm %s1412_s29, 512  ;;  %s932_s5 = scalar_lea.hbm %s1479_s8, 512 }
 0x1c5   : > { %p929_p0 = scmp.ne.s32.totalorder %s1412_s29, %s928_s16  ;;  %p933_p2 = scmp.lt.u32.totalorder %s1412_s29, %s1479_s8 }
 0x1c6   : > { %p934_p6 = scmp.lt.u32.totalorder %s932_s5, %s928_s16  ;;  %p936_p9 = scmp.lt.u32.totalorder %s928_s16, %s1412_s29 }
 0x1c7   : > { %p930_p3 = pnand %p929_p0, %p1516_p4 }
 0x1c8   : > { %p935_p10 = por %p934_p6, %p933_p2 }
 0x1c9   : > { %p931_p13 = pneg %p930_p3 }
 0x1ca   : > { %p937_p7 = por %p936_p9, %p935_p10 }
 0x1cc   : > { %p938_p11 = pnand %p937_p7, %p931_p13 }
 0x1ce   : > { %941 = shalt.err (!%p938_p11)
}
 0x1cf   : > { %s1046_s1 = smov 128   ;;  %s1047_s28 = smov 8  }
 0x1d0   : > { %682 = dma.vmem_to_hbm [thread:$0]  (%p1516_p4), %s1407_s14, 512, %s1412_s29, %s1416_s9, %s1046_s1, %s1046_s1, %s1047_s28  }
 0x1d1 PF: > { %p700_p12 = scmp.ge.s32.totalorder %s1034_s24, 2  ;;  %s513_s10 = sand.u32 1, %s998_s3  }
 0x1d2   : > { %p1517_p8 = scmp.ne.s32.totalorder %s1499_s18, 0  ;;  %s514_s11 = scalar_lea.sflag [#allocation10], %s513_s10 }
 0x1d4   : > { %p696_p1 = pnand %p700_p12, %p1517_p8 }
 0x1d6   : > { %993 = dma.done.wait (!%p696_p1), %s514_s11, 512  }
 0x1d7   : > { %995 = vsyncadd (!%p696_p1), %s514_s11, 4294966784  ;;  %s1518_s19 = sld [smem:[#allocation25_spill]]  ;;  %s1519_s17 = sld [smem:[#allocation26_spill]] }
 0x1d8   : > { %s1520_s15 = sld [smem:[#allocation23_spill]]  ;;  %s1521_s23 = sld [smem:[#allocation24_spill]] }
 0x1d9   : > { %p40_p4 = scmp.ge.s32.totalorder %s1188_s27, 6   ;;  %s1522_s3 = smov %s1002_s20 }
 0x1da   : > { %s1523_s20 = smov %s1006_s21  ;;  %s1525_s22 = smov %s1014_s0 }
 0x1db   : > { %s1526_s0 = smov %s1018_s4  ;;  %s1528_s1 = smov %s1026_s2 }
 0x1dc   : > { %s1530_s24 = smov %s1188_s27  ;;  %42 = sbr.rel (!%p40_p4) target bundleno = 57 (0x39), region = 101 }
 0x1dd   : > { %s1524_s21 = smov %s1518_s19  ;;  %s1527_s4 = smov %s1519_s17 }
 0x1de   : > { %s1529_s2 = smov %s1520_s15 }
 0x1e3   :  { %519 = vsyncpa [#allocation9], 1 }
 0x1e4   :  { %521 = vsyncpa [#allocation9 + $0x1], 1 }
 0x1e5   :  { %522 = vsyncpa [#allocation12], 1 }
 0x1e6   :  { %524 = vsyncpa [#allocation12 + $0x1], 1 }
 0x1e7   :  { %525 = vsyncpa [#allocation10], 1 }
 0x1e8   :  { %527 = vsyncpa [#allocation10 + $0x1], 1 }

</bundles_post_ra>
